<compile_context>
chip_gen: v7x
topology: tpu7x:2x2x1
jax: 0.10.0
libtpu: 0.0.40
codegen_flags: <defaults>
</compile_context>

<pallas_src>
import functools
import math

import jax
import jax.numpy as jnp
from jax.experimental import pallas as pl
from jax.experimental.pallas import tpu as pltpu


def _rope_kernel(pos_ref, theta_ref, x_ref, o_ref, *, d2):
    """Apply RoPE to one (1, row_tile, D) block of the flattened input.

    pos_ref   : (row_tile, 1) f32 -- sequence position of each flattened row.
    theta_ref : (1, D) f32        -- sign-folded theta: -theta for lanes < d2,
                                     +theta for lanes >= d2, duplicated halves.
    x_ref     : (1, row_tile, D)  -- input rows.
    o_ref     : (1, row_tile, D)  -- output rows.

    Because cos is even and sin is odd, angle = pos * theta_signed gives
      cos(angle) == cos(pos*theta)        (unchanged)
      sin(angle) == -sin(pos*theta)  for lanes < d2
    so   x*cos + concat(x[d2:], x[:d2])*sin  ==  x*cos + rotate_half(x)*sin.
    """
    x = x_ref[...].astype(jnp.float32)                 # (1, TR, D)
    angle = pos_ref[...] * theta_ref[...]              # (TR, D) f32, outer product
    cos = jnp.cos(angle)[None]                         # (1, TR, D)  -- EUP
    sin = jnp.sin(angle)[None]                         # sign already folded in
    rotated = jnp.concatenate([x[..., d2:], x[..., :d2]], axis=-1)
    o_ref[...] = (x * cos + rotated * sin).astype(o_ref.dtype)


def _choose_row_tile(B, R, D, itemsize,
                     target_bytes=8 * 1024 * 1024,
                     min_bytes=1 * 1024 * 1024,
                     min_steps=4):
    """Pick rows-per-tile so one x block is ~8 MiB (big blocks = best HBM
    bandwidth), while keeping >= min_steps grid steps for pipelining / v7x
    megacore -- but never shrinking a block below ~1 MiB just to add steps."""
    bytes_per_row = D * itemsize
    tr = max(8, target_bytes // bytes_per_row)
    tr = min(tr, R)
    if tr < R:
        tr = max(8, (tr // 8) * 8)                     # (8,128) sublane constraint

    def steps(t):
        return B * ((R + t - 1) // t)

    while steps(tr) < min_steps and tr > 8 and tr * bytes_per_row > min_bytes:
        new_tr = max(8, ((tr // 2) // 8) * 8)
        if new_tr == tr:
            break
        tr = new_tr
    return min(tr, R)


def rotary_positional_embeddings(x, base: int = 10000, seq_tile: int | None = None,
                                 vmem_limit_bytes: int = 48 * 1024 * 1024):
    """x: [batch, seq_len, n_heads, d] -> same shape/dtype with RoPE applied."""
    B, S, H, D = x.shape
    assert D % 2 == 0, "RoPE head dim must be even"
    d2 = D // 2
    R = S * H                                          # flattened (seq, head) rows

    # theta = 1 / base^(arange(0, d, 2)/d)  -- the module's frozen parameter.
    theta = 1.0 / (base ** (jnp.arange(0, D, 2, dtype=jnp.float32) / D))      # [d/2]
    # Fold rotate_half's sign into theta: lanes < d2 get -theta (sin flips,
    # cos unchanged).  Shape (1, D), VMEM-resident across the whole grid.
    theta_row = jnp.concatenate([-theta, theta])[None, :]                     # (1, D)

    # Per-row sequence position of the flattened [S*H] rows (row // H), built
    # once on the host side so the kernel needs no vector integer division.
    pos_rows = jnp.repeat(jnp.arange(S, dtype=jnp.float32), H)[:, None]       # (R, 1)

    # View x as [B, S*H, D]: adjacent-dim merge, no data movement; gives
    # sublane-dense blocks even when n_heads < 8.
    x3 = x.reshape(B, R, D)

    itemsize = jnp.dtype(x.dtype).itemsize
    if seq_tile is None:
        tr = _choose_row_tile(B, R, D, itemsize)
    else:
        tr = min(int(seq_tile) * H, R)
        if tr < R:
            tr = max(8, (tr // 8) * 8)

    n_tiles = (R + tr - 1) // tr
    grid = (n_tiles, B)                                # row-tiles outer, batch inner

    kernel = functools.partial(_rope_kernel, d2=d2)

    cost = pl.CostEstimate(
        flops=3 * B * R * D,                           # 2 mul + 1 add per element
        transcendentals=2 * B * R * D,                 # in-kernel cos + sin
        bytes_accessed=2 * B * R * D * itemsize,       # stream x in + out
    )

    out3 = pl.pallas_call(
        kernel,
        out_shape=jax.ShapeDtypeStruct((B, R, D), x.dtype),
        grid_spec=pltpu.PrefetchScalarGridSpec(
            num_scalar_prefetch=0,
            grid=grid,
            in_specs=[
                pl.BlockSpec((tr, 1), lambda s, b: (s, 0)),        # per-row position
                pl.BlockSpec((1, D), lambda s, b: (0, 0)),         # theta (resident)
                pl.BlockSpec((1, tr, D), lambda s, b: (b, s, 0)),  # x rows
            ],
            out_specs=pl.BlockSpec((1, tr, D), lambda s, b: (b, s, 0)),
        ),
        compiler_params=pltpu.CompilerParams(
            dimension_semantics=("parallel", "parallel"),
            vmem_limit_bytes=vmem_limit_bytes,
        ),
        cost_estimate=cost,
        input_output_aliases={2: 0},                   # x block aliases the output
    )(pos_rows, theta_row, x3)

    return out3.reshape(B, S, H, D)


def _reference(x, base: int = 10000):
    """Pure-JAX mirror of the PyTorch forward for verification."""
    B, S, H, D = x.shape
    d2 = D // 2
    theta = 1.0 / (base ** (jnp.arange(0, D, 2, dtype=jnp.float32) / D))
    seq_idx = jnp.arange(S, dtype=jnp.float32)
    idx_theta = jnp.einsum("n,d->nd", seq_idx, theta)
    idx_theta2 = jnp.concatenate([idx_theta, idx_theta], axis=1)
    neg_half_x = jnp.concatenate([-x[:, :, :, d2:], x[:, :, :, :d2]], axis=-1)
    return (x * jnp.cos(idx_theta2)[None, :, None, :]
            + neg_half_x * jnp.sin(idx_theta2)[None, :, None, :]).astype(x.dtype)


if __name__ == "__main__":
    key = jax.random.PRNGKey(0)

    # Case 1: small head dim (D=32), single row-tile per batch (grid (1, 2)).
    B, S, H, D = 2, 8, 4, 32
    x1 = jax.random.normal(key, (B, S, H, D), dtype=jnp.float32)
    out1 = rotary_positional_embeddings(x1)
    jax.block_until_ready(out1)
    ref1 = _reference(x1)
    assert out1.shape == x1.shape and out1.dtype == x1.dtype
    # Tolerance allows a few ULPs difference between the in-kernel (EUP) and
    # XLA transcendentals at angles up to O(S).
    assert jnp.allclose(out1, ref1, atol=1e-4, rtol=1e-4), "mismatch (D=32)"

    # Case 2: lane-dense head dim (D=128) with a forced multi-tile grid
    # (row_tile = 16*4 = 64 rows -> grid (4, 2)) exercising the pipelined
    # BlockSpecs and non-zero per-tile position offsets.
    B, S, H, D = 2, 64, 4, 128
    x2 = jax.random.normal(jax.random.PRNGKey(1), (B, S, H, D), dtype=jnp.float32)
    out2 = rotary_positional_embeddings(x2, seq_tile=16)
    jax.block_until_ready(out2)
    ref2 = _reference(x2)
    assert out2.shape == x2.shape and out2.dtype == x2.dtype
    assert jnp.allclose(out2, ref2, atol=1e-4, rtol=1e-4), "mismatch (D=128)"

    print("KERNEL_OK")
</pallas_src>

<mosaic_0001>
module attributes {stable_mosaic.version = 11 : i64} {
  func.func @_rope_kernel(%arg0: i32, %arg1: i32, %arg2: memref<32x1xf32, #tpu.memory_space<vmem>>, %arg3: memref<1x32xf32, #tpu.memory_space<vmem>>, %arg4: memref<1x32x32xf32, #tpu.memory_space<vmem>>, %arg5: memref<1x32x32xf32, #tpu.memory_space<vmem>>) attributes {dimension_semantics = [#tpu.dimension_semantics<parallel>, #tpu.dimension_semantics<parallel>], iteration_bounds = array<i64: 1, 2>, scalar_prefetch = 0 : i64, scratch_operands = 0 : i64, tpu.core_type = #tpu.core_type<tc>, window_params = [{transform_indices = @transform_0, window_bounds = array<i64: 32, 1>}, {pipeline_mode = #tpu.pipeline_mode<synchronous>, transform_indices = @transform_1, window_bounds = array<i64: 1, 32>}, {transform_indices = @transform_2, window_bounds = array<i64: 1, 32, 32>}, {transform_indices = @transform_3, window_bounds = array<i64: 1, 32, 32>}]} {
    %c0 = arith.constant 0 : index
    %c0_0 = arith.constant 0 : index
    %c0_1 = arith.constant 0 : index
    %0 = vector.load %arg4[%c0, %c0_0, %c0_1] : memref<1x32x32xf32, #tpu.memory_space<vmem>>, vector<1x32x32xf32>
    %c0_2 = arith.constant 0 : index
    %c0_3 = arith.constant 0 : index
    %1 = vector.load %arg2[%c0_2, %c0_3] : memref<32x1xf32, #tpu.memory_space<vmem>>, vector<32x1xf32>
    %c0_4 = arith.constant 0 : index
    %c0_5 = arith.constant 0 : index
    %2 = vector.load %arg3[%c0_4, %c0_5] : memref<1x32xf32, #tpu.memory_space<vmem>>, vector<1x32xf32>
    %3 = vector.broadcast %1 : vector<32x1xf32> to vector<32x32xf32>
    %4 = vector.broadcast %2 : vector<1x32xf32> to vector<32x32xf32>
    %5 = arith.mulf %3, %4 : vector<32x32xf32>
    %6 = math.cos %5 : vector<32x32xf32>
    %7 = vector.shape_cast %6 : vector<32x32xf32> to vector<1x32x32xf32>
    %8 = math.sin %5 : vector<32x32xf32>
    %9 = vector.shape_cast %8 : vector<32x32xf32> to vector<1x32x32xf32>
    %10 = vector.extract_strided_slice %0 {offsets = [0, 0, 16], sizes = [1, 32, 16], strides = [1, 1, 1]} : vector<1x32x32xf32> to vector<1x32x16xf32>
    %11 = vector.extract_strided_slice %0 {offsets = [0, 0, 0], sizes = [1, 32, 16], strides = [1, 1, 1]} : vector<1x32x32xf32> to vector<1x32x16xf32>
    %12 = tpu.concatenate %10, %11 in 2 : vector<1x32x16xf32>, vector<1x32x16xf32> -> vector<1x32x32xf32>
    %13 = arith.mulf %0, %7 : vector<1x32x32xf32>
    %14 = arith.mulf %12, %9 : vector<1x32x32xf32>
    %15 = arith.addf %13, %14 : vector<1x32x32xf32>
    %c0_6 = arith.constant 0 : index
    %c0_7 = arith.constant 0 : index
    %c0_8 = arith.constant 0 : index
    %16 = vector.load %arg5[%c0_6, %c0_7, %c0_8] : memref<1x32x32xf32, #tpu.memory_space<vmem>>, vector<1x32x32xf32>
    tpu.vector_store %arg5[%c0_6, %c0_7, %c0_8], %15 {strides = array<i32>} : memref<1x32x32xf32, #tpu.memory_space<vmem>>, vector<1x32x32xf32>,
    return
  }
  func.func @transform_0(%arg0: i32, %arg1: i32) -> (i32, i32) {
    %c0_i32 = arith.constant 0 : i32
    %c0_i32_0 = arith.constant 0 : i32
    return %arg0, %c0_i32 : i32, i32
  }
  func.func @transform_1(%arg0: i32, %arg1: i32) -> (i32, i32) {
    %c0_i32 = arith.constant 0 : i32
    %c0_i32_0 = arith.constant 0 : i32
    %c0_i32_1 = arith.constant 0 : i32
    return %c0_i32, %c0_i32_0 : i32, i32
  }
  func.func @transform_2(%arg0: i32, %arg1: i32) -> (i32, i32, i32) {
    %c0_i32 = arith.constant 0 : i32
    %c0_i32_0 = arith.constant 0 : i32
    return %arg1, %arg0, %c0_i32 : i32, i32, i32
  }
  func.func @transform_3(%arg0: i32, %arg1: i32) -> (i32, i32, i32) {
    %c0_i32 = arith.constant 0 : i32
    %c0_i32_0 = arith.constant 0 : i32
    return %arg1, %arg0, %c0_i32 : i32, i32, i32
  }
}

</mosaic_0001>

<bundles_post_ra>
// kernel: tpu_custom_call.1
= control target key start
LH: loop header
LB: loop body
LE: loop exit
PB: predicated region body
PF: predicated region fallthrough
CT: control target
= control target key end

     0   :  { %8 = vsyncpa [#allocation3], 0  ;;  %s2140_s0 = inlined_call_operand.vmem [shape: f32[32,1], index: 0, kind: input, shape index: {}]   ;;  %s2141_s1 = inlined_call_operand.vmem [shape: f32[1,32], index: 1, kind: input, shape index: {}]   ;;  %s2142_s2 = inlined_call_operand.hbm [shape: f32[2,32,32], index: 2, kind: input, shape index: {}, may-alias: {2,3}]   ;;  %s2143_s3 = inlined_call_operand.hbm [shape: f32[2,32,32], index: 3, kind: output, shape index: {}, may-alias: {2,3}]  }
   0x1   :  { %10 = vsyncpa [#allocation3 + $0x1], 0 }
   0x2   :  { %11 = vsyncpa [#allocation4], 0 }
   0x3   :  { %13 = vsyncpa [#allocation4 + $0x1], 0  ;;  %s1575_s12 = smov 0   ;;  %s1577_s13 = smov 0  }
   0x4   :  { %s1579_s14 = smov 0   ;;  %s1581_s15 = smov 0  }
   0x5   :  { %s1583_s16 = smov 0   ;;  %s1585_s17 = smov 0  }
   0x6 LB: > { %s1266_s18 = sadd.s32 4294967295, %s1538_s17   ;;  %s1267_s19 = sadd.s32 4294967294, %s1538_s17   ;;  %s1538_s17 = sphi %s1585_s17, %s19_s17   ;;  %s1534_s16 = sphi %s1583_s16, %s2164_s16   ;;  %s1530_s15 = sphi %s1581_s15, %s2163_s15   ;;  %s1526_s14 = sphi %s1579_s14, %s2162_s14   ;;  %s1522_s13 = sphi %s1577_s13, %s2161_s13   ;;  %s1518_s12 = sphi %s1575_s12, %s2160_s12  }
   0x7   : > { %s28_s20 = sadd.s32 1, %s1534_s16  ;;  %s87_s21 = sadd.s32 1, %s1526_s14 }
   0x8   : > { %p29_p0 = scmp.ge.s32.totalorder %s28_s20, 2  ;;  %p94_p1 = scmp.ne.s32.totalorder %s1526_s14, %s1522_s13 }
   0x9   : > { %p95_p2 = scmp.eq.s32.totalorder %s1538_s17, 0  ;;  %p100_p3 = scmp.ne.s32.totalorder %s1522_s13, %s1518_s12 }
   0xa   : > { %s2166_s20 = smov (%p29_p0, %s28_s20), 0  ;;  %p101_p5 = scmp.eq.s32.totalorder %s1266_s18, 0 }
   0xb   : > { %p1616_p4 = por %p95_p2, %p94_p1  ;;  %s82_s23 = ssub.s32 %s1534_s16, %s2166_s20 }
   0xc   : > { %p126_p6 = scmp.eq.s32.totalorder %s1266_s18, 1  ;;  %p85_p7 = scmp.eq.s32.totalorder %s82_s23, 0 }
   0xd   : > { %p1622_p8 = por %p101_p5, %p100_p3  ;;  %p132_p10 = scmp.eq.s32.totalorder %s1267_s19, 1 }
   0xe   : > { %p1626_p9 = por %p126_p6, %p94_p1  ;;  %p1345_p13 = scmp.lt.s32.totalorder %s1538_s17, 2 }
   0xf   : > { %s1631_s26 = scalar_select %p85_p7, %s1526_s14, %s87_s21  }
  0x10   : > { %s2147_s25 = scalar_select %p1626_p9, 1, 0 }
  0x11   : > { %p1633_p11 = por %p132_p10, %p100_p3  ;;  %s164_s28 = sand.u32 1, %s1526_s14  }
  0x12   : > { %s1271_s29 = sshll.u32 %s164_s28, 5  ;;  %s1315_s30 = sshll.u32 %s1534_s16, 9 }
  0x13   : > { %s2148_s27 = scalar_select %p1633_p11, 1, 0 }
  0x14   : > { %s1644_s6 = scalar_lea.hbm %s2142_s2, %s1315_s30  ;;  %s168_s7 = scalar_lea.vmem [#allocation2], %s1271_s29 }
  0x15   : > { %s177_s8 = sshll.u32 %s168_s7, 4  ;;  %p1650_p0 = pnand %p1345_p13, %p1616_p4  ;;  %s1646_s8 = int_to_ptr.vmem [resolvable:$true] %s177_s8 }
  0x16   : > { %s1655_s10 = scalar_lea.sflag [#allocation3], %s164_s28  ;;  %s1426_s11 = scalar_lea.hbm %s1644_s6, 512 }
  0x17   : > { %p1427_p2 = scmp.ne.s32.totalorder %s1644_s6, %s1426_s11  ;;  %p1428_p3 = pneg %p1650_p0 }
  0x18   : > { %s1431_s21 = scalar_lea.hbm %s2142_s2, 1024  ;;  %p1432_p4 = scmp.lt.u32.totalorder %s1644_s6, %s2142_s2 }
  0x19   : > { %p1429_p5 = pnand %p1428_p3, %p1427_p2  ;;  %p1433_p7 = scmp.lt.u32.totalorder %s1431_s21, %s1426_s11 }
  0x1a   : > { %p1435_p13 = scmp.lt.u32.totalorder %s1426_s11, %s1644_s6 }
  0x1b   : > { %p1430_p6 = pneg %p1429_p5  ;;  %p1434_p10 = por %p1433_p7, %p1432_p4 }
  0x1d   : > { %p1436_p12 = por %p1435_p13, %p1434_p10 }
  0x1f   : > { %p1437_p1 = pnand %p1436_p12, %p1430_p6 }
  0x21   : > { %1440 = shalt.err (!%p1437_p1)
}
  0x22   : > { %s1441_s28 = scalar_lea.vmem %s1646_s8, 512  ;;  %s1540_s29 = smov [#allocation2]  }
  0x23   : > { %p1442_p2 = scmp.ne.s32.totalorder %s1646_s8, %s1441_s28  ;;  %s1446_s30 = sshll.u32 %s1540_s29, 4  ;;  %s1447_s30 = int_to_ptr.vmem [resolvable:$false] %s1446_s30 }
  0x24   : > { %s1448_s4 = scalar_lea.vmem %s1447_s30, 1024  ;;  %p1449_p9 = scmp.lt.s32.totalorder %s1646_s8, %s1447_s30 }
  0x25   : > { %p1444_p5 = pnand %p1442_p2, %p1428_p3  ;;  %p1450_p4 = scmp.lt.s32.totalorder %s1448_s4, %s1441_s28 }
  0x27   : > { %p1445_p11 = pneg %p1444_p5  ;;  %p1451_p7 = por %p1450_p4, %p1449_p9 }
  0x29   : > { %p1452_p10 = pnand %p1451_p7, %p1445_p11 }
  0x2b   : > { %1455 = shalt.err (!%p1452_p10)
}
  0x2c   : > { %s1541_s5 = smov 128   ;;  %s1542_s7 = smov 8  }
  0x2d   : > { %1340 = dma.hbm_to_vmem [thread:$0]  (!%p1650_p0), %s1644_s6, 512, %s1646_s8, %s1655_s10, %s1541_s5, %s1541_s5, %s1542_s7  }
  0x2e   : > { %p185_p12 = scmp.lt.s32.totalorder %s1538_s17, 3  ;;  %p2150_p1 = scmp.ge.s32.totalorder %s1538_s17, 1 }
  0x30   : > { %p186_p3 = pnand %p2150_p1, %p185_p12 }
  0x31   : > { %s1687_s11 = sand.u32 (!%p186_p3), 1, %s1522_s13  }
  0x32   : > { %189 = sbr.rel (%p186_p3) target bundleno = 339 (0x153), region = 32  ;;  %s1275_s18 = sshll.u32 (!%p186_p3), %s1687_s11, 5 }
  0x33   : > { %s192_s19 = scalar_lea.sflag (!%p186_p3), [#allocation3], %s1687_s11  ;;  %s195_s21 = scalar_lea.vmem (!%p186_p3), [#allocation2], %s1275_s18 }
  0x39   : > { %1509 = dma.done.wait (%p1622_p8), %s192_s19, 512  }
  0x3a   : > { %1511 = vsyncadd (%p1622_p8), %s192_s19, 4294966784  ;;  %v1543_v0 = vmov 0   ;;  %v237_v1 = vld [vmem:[%s2140_s0 + $0x10] sm:$0xff]  ;;  %v235_v2 = vld [vmem:[%s2140_s0] sm:$0xff]  ;;  %s1544_s29 = smov 112   ;;  %s1545_s30 = smov 16  }
  0x3b   : > { %1409 = vset.pattern.permute.xlu1 %v1543_v0  ;;  %1408 = vset.pattern.permute.xlu0 %v1543_v0  ;;  %v238_v3 = vld [vmem:[%s2140_s0 + $0x18] sm:$0xff]  ;;  %v236_v4 = vld [vmem:[%s2140_s0 + $0x8] sm:$0xff]  ;;  %v1711_v6 = vld [vmem:[%s195_s21] sm:$0xff]  ;;  %v1546_v48 = vmov 683565275   ;;  %s2040_s7 = scalar_lea.vmem [#allocation5], %s1275_s18 }
  0x3c   : > { %252 = vperm.xlu1 %1409, %v237_v1   ;;  %242 = vperm.xlu0 %1408, %v235_v2   ;;  %v1709_v5 = vld [vmem:[%s195_s21 + $0x8] sm:$0xff]  ;;  %v1715_v7 = vld [vmem:[%s195_s21 + $0x18] sm:$0xff]  ;;  %v1717_v8 = vld [vmem:[%s195_s21 + $0x10] sm:$0xff]  ;;  %v1547_v50 = vmov 2475754826   ;;  %s1316_s18 = sshll.u32 %s1530_s15, 9 }
  0x3d   : > { %v1277_v9 = vld [vmem:[%s2141_s1] ss:$0 sm:$0xff]  ;;  %v1548_v53 = vmov 2131351028   ;;  %v1549_v55 = vmov 2102212464   ;;  %s2087_s8 = scalar_lea.hbm %s2143_s3, %s1316_s18 }
  0x3e   : > { %v1550_v57 = vmov 920167782   ;;  %v1551_v0 = vmov 1326507024   ;;  %s1164_s19 = sshll.u32 %s2040_s7, 4  ;;  %s1149_s15 = scalar_lea.sflag [#allocation4], %s1687_s11  ;;  %s2089_s19 = int_to_ptr.vmem [resolvable:$true] %s1164_s19 }
  0x3f   : > { %s1456_s9 = scalar_lea.vmem %s2089_s19, 512  ;;  %p2157_p9 = scmp.ne.s32.totalorder %s2147_s25, 0 }
  0x40   : > { %257 = vperm.xlu1 %1409, %v238_v3   ;;  %247 = vperm.xlu0 %1408, %v236_v4   ;;  %p1457_p8 = scmp.ne.s32.totalorder %s2089_s19, %s1456_s9  ;;  %s1552_s10 = smov [#allocation5]  }
  0x41   : > { %s1460_s22 = sshll.u32 %s1552_s10, 4  ;;  %s1461_s22 = int_to_ptr.vmem [resolvable:$false] %s1460_s22 }
  0x42   : > { %p1458_p11 = pnand %p1457_p8, %p2157_p9  ;;  %s1462_s23 = scalar_lea.vmem %s1461_s22, 1024 }
  0x43   : > { %p1463_p6 = scmp.lt.s32.totalorder %s2089_s19, %s1461_s22  ;;  %p1464_p13 = scmp.lt.s32.totalorder %s1462_s23, %s1456_s9 }
  0x44   : > { %1104 = vrot.lane.b32.xlu1 %v1709_v5, %s1544_s29  ;;  %1102 = vrot.lane.b32.xlu0 %v1711_v6, %s1544_s29  ;;  %p1459_p0 = pneg %p1458_p11 }
  0x45   : > { %p1465_p2 = por %p1464_p13, %p1463_p6 }
  0x47   : > { %p1466_p5 = pnand %p1465_p2, %p1459_p0 }
  0x48   : > { %1108 = vrot.lane.b32.xlu1 %v1715_v7, %s1544_s29  ;;  %1106 = vrot.lane.b32.xlu0 %v1717_v8, %s1544_s29 }
  0x4c   : > { %1116 = vrot.lane.b32.xlu1 %v1709_v5, %s1545_s30  ;;  %1114 = vrot.lane.b32.xlu0 %v1711_v6, %s1545_s30 }
  0x50   : > { %1120 = vrot.lane.b32.xlu1 %v1715_v7, %s1545_s30  ;;  %1118 = vrot.lane.b32.xlu0 %v1717_v8, %s1545_s30 }
  0xbb   : > { %v253_v10 = vpop.permute.xlu1 %252  ;;  %v243_v11 = vpop.permute.xlu0 %242 }
  0xbc   : > { %v1728_v12 = vmul.f32 %v1277_v9, %v253_v10  ;;  %v1730_v13 = vmul.f32 %v1277_v9, %v243_v11 }
  0xbe   : > { %v476_v14 = vand.u32 2147483647, %v1728_v12  ;;  %v479_v15 = vand.u32 2139095040, %v1728_v12  ;;  %v270_v16 = vand.u32 2147483647, %v1730_v13  ;;  %v273_v17 = vand.u32 2139095040, %v1730_v13 }
  0xbf   : > { %v258_v18 = vpop.permute.xlu1 %257  ;;  %v248_v22 = vpop.permute.xlu0 %247 }
  0xc0   : > { %v480_v19 = vshrl.u32 %v479_v15, 23  ;;  %v483_v20 = vand.u32 8388607, %v476_v14  ;;  %v1738_v21 = vmul.f32 %v1277_v9, %v258_v18  ;;  %v274_v23 = vshrl.u32 %v273_v17, 23 }
  0xc1   : > { %v277_v24 = vand.u32 8388607, %v270_v16  ;;  %v1744_v29 = vmul.f32 %v1277_v9, %v248_v22 }
  0xc2   : > { %v1286_v25 = vadd.s32 4294967169, %v480_v19  ;;  %v579_v26 = vand.u32 2147483647, %v1738_v21  ;;  %v1278_v27 = vadd.s32 4294967169, %v274_v23  ;;  %v582_v28 = vand.u32 2139095040, %v1738_v21 }
  0xc3   : > { %v484_v30 = vor.u32 8388608, %v483_v20  ;;  %v278_v32 = vor.u32 8388608, %v277_v24  ;;  %v373_v38 = vand.u32 2147483647, %v1744_v29 }
  0xc4   : > { %v486_v31 = vadd.s32 1, %v1286_v25  ;;  %v280_v33 = vadd.s32 1, %v1278_v27  ;;  %v583_v34 = vshrl.u32 %v582_v28, 23  ;;  %v1748_v35 = vand.u32 8388607, %v579_v26 }
  0xc5   : > { %v1751_v41 = vshll.u32 %v484_v30, 8  ;;  %v1755_v45 = vshll.u32 %v278_v32, 8 }
  0xc6   : > { %vm487_vm0 = vcmp.gt.s32.totalorder %v486_v31, 0  ;;  %vm281_vm1 = vcmp.gt.s32.totalorder %v280_v33, 0  ;;  %v1290_v37 = vadd.s32 4294967169, %v583_v34  ;;  %v587_v46 = vor.u32 8388608, %v1748_v35 }
  0xc7   : > { %v488_v36 = vsel %vm487_vm0, %v486_v31, 0  ;;  %v282_v42 = vsel %vm281_vm1, %v280_v33, 0 }
  0xc8   : > { %v489_v39 = vshrl.u32 %v488_v36, 5  ;;  %v490_v40 = vand.u32 31, %v488_v36  ;;  %v1753_v43 = vshrl.u32 %v282_v42, 5  ;;  %v284_v44 = vand.u32 31, %v282_v42 }
  0xc9   : > { %v1760_v52 = vadd.s32 1, %v1290_v37 }
  0xca   : > { %v491_v47 = vsub.s32 32, %v490_v40  ;;  %v493_v49 = vshll.u32 %v1546_v48, %v490_v40  ;;  %v496_v51 = vshll.u32 %v1547_v50, %v490_v40  ;;  %v499_v54 = vshll.u32 %v1548_v53, %v490_v40 }
  0xcb   : > { %v502_v56 = vshll.u32 %v1549_v55, %v490_v40  ;;  %v505_v58 = vshll.u32 %v1550_v57, %v490_v40  ;;  %vm508_vm2 = vcmp.lt.s32.totalorder %v489_v39, 1  ;;  %vm509_vm3 = vcmp.lt.s32.totalorder %v489_v39, 2 }
  0xcc   : > { %v494_v59 = vshrl.u32 %v1547_v50, %v491_v47  ;;  %v497_v60 = vshrl.u32 %v1548_v53, %v491_v47  ;;  %v500_v61 = vshrl.u32 %v1549_v55, %v491_v47  ;;  %v492_v62 = vshrl.u32 %v1546_v48, %v491_v47 }
  0xcd   : > { %v503_v63 = vshrl.u32 %v1550_v57, %v491_v47  ;;  %v506_v1 = vshrl.u32 %v1551_v0, %v491_v47  ;;  %vm510_vm4 = vcmp.lt.s32.totalorder %v489_v39, 3  ;;  %v285_v9 = vsub.s32 32, %v284_v44 }
  0xce   : > { %v495_v2 = vor.u32 %v494_v59, %v493_v49  ;;  %v498_v3 = vor.u32 %v497_v60, %v496_v51  ;;  %v501_v4 = vor.u32 %v500_v61, %v499_v54  ;;  %vm511_vm5 = vcmp.lt.s32.totalorder %v489_v39, 4 }
  0xcf   : > { %v504_v10 = vor.u32 %v503_v63, %v502_v56  ;;  %v507_v11 = vor.u32 %v506_v1, %v505_v58  ;;  %v287_v15 = vshll.u32 %v1546_v48, %v284_v44  ;;  %v290_v25 = vshll.u32 %v1547_v50, %v284_v44 }
  0xd0   : > { %v512_v17 = vsel %vm508_vm2, %v492_v62, %v495_v2  ;;  %v513_v18 = vsel %vm511_vm5, %v501_v4, 2102212464  ;;  %v516_v19 = vsel %vm508_vm2, %v495_v2, %v498_v3  ;;  %v520_v20 = vsel %vm508_vm2, %v498_v3, %v501_v4 }
  0xd1   : > { %v514_v22 = vsel %vm510_vm4, %v498_v3, %v513_v18  ;;  %v517_v23 = vsel %vm511_vm5, %v504_v10, 920167782  ;;  %v521_v24 = vsel %vm511_vm5, %v507_v11, 1326507024  ;;  %v286_v30 = vshrl.u32 %v1546_v48, %v285_v9 }
  0xd2   : > { %v518_v27 = vsel %vm510_vm4, %v501_v4, %v517_v23  ;;  %v522_v28 = vsel %vm510_vm4, %v504_v10, %v521_v24  ;;  %v288_v31 = vshrl.u32 %v1547_v50, %v285_v9  ;;  %v515_v32 = vsel %vm509_vm3, %v512_v17, %v514_v22 }
  0xd3   : > { %v519_v33 = vsel %vm509_vm3, %v516_v19, %v518_v27  ;;  %v523_v34 = vsel %vm509_vm3, %v520_v20, %v522_v28  ;;  %v291_v36 = vshrl.u32 %v1548_v53, %v285_v9  ;;  %v293_v54 = vshll.u32 %v1548_v53, %v284_v44 }
  0xd4   : > { %v1786_v37 = vmul.u32.u64.low %v1751_v41, %v523_v34  ;;  %v1787_v40 = vmul.u32.u64.high %v1751_v41, %v523_v34, %v1786_v37  ;;  %v1790_v42 = vmul.u32.u64.low %v1751_v41, %v519_v33  ;;  %v1791_v47 = vmul.u32.u64.high %v1751_v41, %v519_v33, %v1790_v42 }
  0xd5   : > { %v289_v49 = vor.u32 %v288_v31, %v287_v15  ;;  %v292_v51 = vor.u32 %v291_v36, %v290_v25  ;;  %v294_v56 = vshrl.u32 %v1549_v55, %v285_v9  ;;  %v531_v58 = vmul.u32 %v1751_v41, %v515_v32 }
  0xd6   : > { %v296_v39 = vshll.u32 %v1549_v55, %v284_v44  ;;  %v297_v59 = vshrl.u32 %v1550_v57, %v285_v9  ;;  %v300_v60 = vshrl.u32 %v1551_v0, %v285_v9  ;;  %v299_v62 = vshll.u32 %v1550_v57, %v284_v44 }
  0xd7   : > { %v295_v61 = vor.u32 %v294_v56, %v293_v54  ;;  %vm302_vm6 = vcmp.lt.s32.totalorder %v1753_v43, 1  ;;  %vm303_vm7 = vcmp.lt.s32.totalorder %v1753_v43, 2  ;;  %vm533_vm8 = vc.u32 %v1787_v40, %v1790_v42 }
  0xd8   : > { %v534_v63 = vadd.s32 1, %v1791_v47  ;;  %v298_v1 = vor.u32 %v297_v59, %v296_v39  ;;  %vm304_vm9 = vcmp.lt.s32.totalorder %v1753_v43, 3  ;;  %v301_v41 = vor.u32 %v300_v60, %v299_v62 }
  0xd9   : > { %vm305_vm10 = vcmp.lt.s32.totalorder %v1753_v43, 4  ;;  %v306_v2 = vsel %vm302_vm6, %v286_v30, %v289_v49  ;;  %v310_v3 = vsel %vm302_vm6, %v289_v49, %v292_v51  ;;  %v314_v10 = vsel %vm302_vm6, %v292_v51, %v295_v61 }
  0xda   : > { %v535_v4 = vsel %vm533_vm8, %v534_v63, %v1791_v47  ;;  %v307_v9 = vsel %vm305_vm10, %v295_v61, 2102212464  ;;  %v311_v44 = vsel %vm305_vm10, %v298_v1, 920167782  ;;  %v315_v18 = vsel %vm305_vm10, %v301_v41, 1326507024 }
  0xdb   : > { %v536_v11 = vadd.s32 %v535_v4, %v531_v58  ;;  %v308_v15 = vsel %vm304_vm9, %v292_v51, %v307_v9  ;;  %v312_v17 = vsel %vm304_vm9, %v295_v61, %v311_v44  ;;  %v316_v20 = vsel %vm304_vm9, %v298_v1, %v315_v18 }
  0xdc   : > { %v313_v19 = vsel %vm303_vm7, %v310_v3, %v312_v17  ;;  %vm590_vm11 = vcmp.gt.s32.totalorder %v1760_v52, 0  ;;  %v376_v22 = vand.u32 2139095040, %v1744_v29  ;;  %v317_v24 = vsel %vm303_vm7, %v314_v10, %v316_v20 }
  0xdd   : > { %v537_v23 = vadd.s32 536870912, %v536_v11  ;;  %v1814_v25 = vmul.u32.u64.low %v1755_v45, %v313_v19  ;;  %v1815_v27 = vmul.u32.u64.high %v1755_v45, %v313_v19, %v1814_v25  ;;  %v309_v28 = vsel %vm303_vm7, %v306_v2, %v308_v15 }
  0xde   : > { %v1821_v30 = vmul.u32.u64.low %v1755_v45, %v317_v24  ;;  %v1822_v31 = vmul.u32.u64.high %v1755_v45, %v317_v24, %v1821_v30  ;;  %v591_v32 = vsel %vm590_vm11, %v1760_v52, 0  ;;  %v1828_v36 = vadd.s32 %v1790_v42, %v1787_v40 }
  0xdf   : > { %v1825_v33 = vshrl.u32 %v537_v23, 30  ;;  %v593_v34 = vand.u32 31, %v591_v32  ;;  %v1832_v37 = vshll.u32 %v587_v46, 8  ;;  %v377_v47 = vshrl.u32 %v376_v22, 23 }
  0xe0   : > { %v1836_v43 = vand.u32 8388607, %v373_v38  ;;  %v325_v51 = vmul.u32 %v1755_v45, %v309_v28  ;;  %v328_v52 = vadd.s32 1, %v1815_v27  ;;  %vm327_vm12 = vc.u32 %v1822_v31, %v1814_v25 }
  0xe1   : > { %v539_v49 = vshll.u32 %v1825_v33, 30  ;;  %v594_v54 = vsub.s32 32, %v593_v34  ;;  %v592_v40 = vshrl.u32 %v591_v32, 5  ;;  %v596_v35 = vshll.u32 %v1546_v48, %v593_v34 }
  0xe2   : > { %v599_v46 = vshll.u32 %v1547_v50, %v593_v34  ;;  %v329_v56 = vsel %vm327_vm12, %v328_v52, %v1815_v27  ;;  %v602_v39 = vshll.u32 %v1548_v53, %v593_v34  ;;  %v605_v61 = vshll.u32 %v1549_v55, %v593_v34 }
  0xe3   : > { %v1845_v42 = vsub.s32 %v536_v11, %v539_v49  ;;  %v597_v58 = vshrl.u32 %v1547_v50, %v594_v54  ;;  %v330_v45 = vadd.s32 %v329_v56, %v325_v51  ;;  %v600_v59 = vshrl.u32 %v1548_v53, %v594_v54 }
  0xe4   : > { %v603_v60 = vshrl.u32 %v1549_v55, %v594_v54  ;;  %v606_v1 = vshrl.u32 %v1550_v57, %v594_v54  ;;  %v608_v41 = vshll.u32 %v1550_v57, %v593_v34  ;;  %v609_v9 = vshrl.u32 %v1551_v0, %v594_v54 }
  0xe5   : > { %v542_v62 = vsub.s32 0, %v1845_v42  ;;  %v598_v63 = vor.u32 %v597_v58, %v596_v35  ;;  %v331_v2 = vadd.s32 536870912, %v330_v45  ;;  %v601_v3 = vor.u32 %v600_v59, %v599_v46 }
  0xe6   : > { %v604_v4 = vor.u32 %v603_v60, %v602_v39  ;;  %v595_v10 = vshrl.u32 %v1546_v48, %v594_v54  ;;  %v607_v11 = vor.u32 %v606_v1, %v605_v61  ;;  %v1282_v15 = vadd.s32 4294967169, %v377_v47 }
  0xe7   : > { %v1287_v44 = vmin.u32 %v542_v62, %v1845_v42  ;;  %v1859_v17 = vshrl.u32 %v331_v2, 30  ;;  %v610_v18 = vor.u32 %v609_v9, %v608_v41  ;;  %vm611_vm13 = vcmp.lt.s32.totalorder %v592_v40, 1 }
  0xe8   : > { %vm614_vm14 = vcmp.lt.s32.totalorder %v592_v40, 4  ;;  %vm612_vm15 = vcmp.lt.s32.totalorder %v592_v40, 2  ;;  %v619_v22 = vsel %vm611_vm13, %v598_v63, %v601_v3  ;;  %vm613_vm0 = vcmp.lt.s32.totalorder %v592_v40, 3 }
  0xe9   : > { %v544_v19 = vclz %v1287_v44  ;;  %v616_v20 = vsel %vm614_vm14, %v604_v4, 2102212464  ;;  %v333_v23 = vshll.u32 %v1859_v17, 30  ;;  %v620_v24 = vsel %vm614_vm14, %v607_v11, 920167782 }
  0xea   : > { %v623_v27 = vsel %vm611_vm13, %v601_v3, %v604_v4  ;;  %v615_v30 = vsel %vm611_vm13, %v595_v10, %v598_v63  ;;  %v621_v32 = vsel %vm613_vm0, %v604_v4, %v620_v24  ;;  %v624_v34 = vsel %vm614_vm14, %v610_v18, 1326507024 }
  0xeb   : > { %v1288_v28 = vadd.s32 4294967294, %v544_v19  ;;  %v1862_v49 = vsub.s32 %v330_v45, %v333_v23  ;;  %v617_v47 = vsel %vm613_vm0, %v601_v3, %v616_v20  ;;  %v622_v51 = vsel %vm612_vm15, %v619_v22, %v621_v32 }
  0xec   : > { %v625_v52 = vsel %vm613_vm0, %v607_v11, %v624_v34  ;;  %v1867_v35 = vmul.u32.u64.low %v1832_v37, %v622_v51  ;;  %v1868_v46 = vmul.u32.u64.high %v1832_v37, %v622_v51, %v1867_v35  ;;  %v618_v61 = vsel %vm612_vm15, %v615_v30, %v617_v47 }
  0xed   : > { %vm1289_vm1 = vcmp.lt.s32.totalorder %v1288_v28, 0  ;;  %v626_v54 = vsel %vm612_vm15, %v623_v27, %v625_v52  ;;  %v336_v58 = vsub.s32 0, %v1862_v49  ;;  %v383_v62 = vadd.s32 1, %v1282_v15 }
  0xee   : > { %v547_v56 = vsel %vm1289_vm1, 0, %v1288_v28  ;;  %v1873_v39 = vmul.u32.u64.low %v1832_v37, %v626_v54  ;;  %v1874_v59 = vmul.u32.u64.high %v1832_v37, %v626_v54, %v1873_v39  ;;  %v381_v41 = vor.u32 8388608, %v1836_v43 }
  0xef   : > { %v548_v45 = vsub.s32 32, %v547_v56  ;;  %v552_v60 = vsub.s32 4294967266, %v547_v56  ;;  %v549_v63 = vshll.u32 %v1845_v42, %v547_v56  ;;  %v1279_v1 = vmin.u32 %v336_v58, %v1862_v49 }
  0xf0   : > { %v637_v4 = vadd.s32 1, %v1868_v46  ;;  %vm384_vm2 = vcmp.gt.s32.totalorder %v383_v62, 0  ;;  %v634_v44 = vmul.u32 %v1832_v37, %v618_v61  ;;  %vm636_vm3 = vc.u32 %v1874_v59, %v1867_v35 }
  0xf1   : > { %v550_v2 = vshrl.u32 %v1828_v36, %v548_v45  ;;  %v553_v3 = vadd.s32 127, %v552_v60  ;;  %v338_v9 = vclz %v1279_v1  ;;  %v385_v40 = vsel %vm384_vm2, %v383_v62, 0 }
  0xf2   : > { %v638_v42 = vsel %vm636_vm3, %v637_v4, %v1868_v46  ;;  %v1886_v43 = vshrl.u32 %v385_v40, 5  ;;  %v387_v36 = vand.u32 31, %v385_v40  ;;  %v326_v20 = vadd.s32 %v1814_v25, %v1822_v31 }
  0xf3   : > { %v551_v10 = vor.u32 %v550_v2, %v549_v63  ;;  %v554_v11 = vshll.u32 %v553_v3, 23  ;;  %v1280_v15 = vadd.s32 4294967294, %v338_v9  ;;  %v639_v18 = vadd.s32 %v638_v42, %v634_v44 }
  0xf4   : > { %v388_v37 = vsub.s32 32, %v387_v36  ;;  %v1890_v23 = vshll.u32 %v381_v41, 8  ;;  %v356_v30 = vsub.s32 4, %v1859_v17  ;;  %v390_v51 = vshll.u32 %v1546_v48, %v387_v36 }
  0xf5   : > { %v555_v19 = vor.u32 4788187, %v554_v11  ;;  %vm1281_vm4 = vcmp.lt.s32.totalorder %v1280_v15, 0  ;;  %v640_v22 = vadd.s32 536870912, %v639_v18  ;;  %v558_v27 = vcvt.s32.f32 %v551_v10 }
  0xf6   : > { %v341_v28 = vsel %vm1281_vm4, 0, %v1280_v15  ;;  %vm405_vm5 = vcmp.lt.s32.totalorder %v1886_v43, 1  ;;  %v391_v31 = vshrl.u32 %v1547_v50, %v388_v37  ;;  %v393_v52 = vshll.u32 %v1547_v50, %v387_v36 }
  0xf7   : > { %v556_v24 = vand.u32 2147483647, %v555_v19  ;;  %v342_v32 = vsub.s32 32, %v341_v28  ;;  %v346_v34 = vsub.s32 4294967266, %v341_v28  ;;  %v1893_v47 = vshrl.u32 %v640_v22, 30 }
  0xf8   : > { %v343_v25 = vshll.u32 %v1862_v49, %v341_v28  ;;  %v394_v54 = vshrl.u32 %v1548_v53, %v388_v37  ;;  %vm272_vm6 = vcmp.lt.s32.totalorder %v1730_v13, 0  ;;  %v397_v39 = vshrl.u32 %v1549_v55, %v388_v37 }
  0xf9   : > { %v344_v46 = vshrl.u32 %v326_v20, %v342_v32  ;;  %v347_v56 = vadd.s32 127, %v346_v34  ;;  %v642_v58 = vshll.u32 %v1893_v47, 30  ;;  %vm478_vm7 = vcmp.lt.s32.totalorder %v1728_v12, 0 }
  0xfa   : > { %v559_v45 = vmul.f32 %v558_v27, %v556_v24  ;;  %v392_v60 = vor.u32 %v391_v31, %v390_v51  ;;  %v395_v61 = vor.u32 %v394_v54, %v393_v52  ;;  %v396_v49 = vshll.u32 %v1548_v53, %v387_v36 }
  0xfb   : > { %v345_v62 = vor.u32 %v344_v46, %v343_v25  ;;  %v348_v63 = vshll.u32 %v347_v56, 23  ;;  %v643_v50 = vsub.s32 %v639_v18, %v642_v58  ;;  %v399_v1 = vshll.u32 %v1549_v55, %v387_v36 }
  0xfc   : > { %v398_v41 = vor.u32 %v397_v39, %v396_v49  ;;  %v400_v2 = vshrl.u32 %v1550_v57, %v388_v37  ;;  %v402_v3 = vshll.u32 %v1550_v57, %v387_v36  ;;  %v403_v4 = vshrl.u32 %v1551_v0, %v388_v37 }
  0xfd   : > { %vm1912_vm8 = vcmp.le.f32.partialorder %v270_v16, 0.7853982  ;;  %v349_v44 = vor.u32 4788187, %v348_v63  ;;  %v645_v53 = vsub.s32 0, %v643_v50  ;;  %v389_v40 = vshrl.u32 %v1546_v48, %v388_v37 }
  0xfe   : > { %vm406_vm9 = vcmp.lt.s32.totalorder %v1886_v43, 2  ;;  %v560_v55 = vxor.u32 2147483648, %v559_v45  ;;  %v352_v10 = vcvt.s32.f32 %v345_v62  ;;  %v401_v11 = vor.u32 %v400_v2, %v399_v1 }
  0xff   : > { %v404_v42 = vor.u32 %v403_v4, %v402_v3  ;;  %v350_v15 = vand.u32 2147483647, %v349_v44  ;;  %v1291_v57 = vmin.u32 %v645_v53, %v643_v50  ;;  %vm407_vm10 = vcmp.lt.s32.totalorder %v1886_v43, 3  ;;  %v1975_v44 = vpop.permute.xlu0 %1102 }
 0x100   : > { %vm408_vm11 = vcmp.lt.s32.totalorder %v1886_v43, 4  ;;  %v409_v16 = vsel %vm405_vm5, %v389_v40, %v392_v60  ;;  %v413_v18 = vsel %vm405_vm5, %v392_v60, %v395_v61  ;;  %v417_v24 = vsel %vm405_vm5, %v395_v61, %v398_v41 }
 0x101   : > { %v410_v0 = vsel %vm408_vm11, %v398_v41, 2102212464  ;;  %v414_v48 = vsel %vm408_vm11, %v401_v11, 920167782  ;;  %v353_v36 = vmul.f32 %v352_v10, %v350_v15  ;;  %v647_v19 = vclz %v1291_v57 }
 0x102   : > { %v411_v20 = vsel %vm407_vm10, %v395_v61, %v410_v0  ;;  %v415_v22 = vsel %vm407_vm10, %v398_v41, %v414_v48  ;;  %v418_v27 = vsel %vm408_vm11, %v404_v42, 1326507024  ;;  %v357_v28 = vsel %vm272_vm6, %v356_v30, %v1859_v17 }
 0x103   : > { %v416_v37 = vsel %vm406_vm9, %v413_v18, %v415_v22  ;;  %v561_v32 = vsel %vm478_vm7, %v560_v55, %v559_v45  ;;  %v354_v34 = vxor.u32 2147483648, %v353_v36  ;;  %v1292_v51 = vadd.s32 4294967294, %v647_v19  ;;  %v1994_v19 = vpop.permute.xlu0 %1106 }
 0x104   : > { %v419_v25 = vsel %vm407_vm10, %v401_v11, %v418_v27  ;;  %v412_v31 = vsel %vm406_vm9, %v409_v16, %v411_v20  ;;  %v1944_v54 = vmul.u32.u64.low %v1890_v23, %v416_v37  ;;  %v1945_v46 = vmul.u32.u64.high %v1890_v23, %v416_v37, %v1944_v54 }
 0x105   : > { %v420_v52 = vsel %vm406_vm9, %v417_v24, %v419_v25  ;;  %v355_v17 = vsel %vm272_vm6, %v354_v34, %v353_v36  ;;  %vm1293_vm12 = vcmp.lt.s32.totalorder %v1292_v51, 0  ;;  %vm1956_vm13 = vcmp.le.f32.partialorder %v476_v14, 0.7853982  ;;  %v1992_v36 = vpop.permute.xlu1 %1104 }
 0x106   : > { %v1951_v30 = vmul.u32.u64.low %v1890_v23, %v420_v52  ;;  %v1952_v56 = vmul.u32.u64.high %v1890_v23, %v420_v52, %v1951_v30  ;;  %v358_v43 = vsel %vm1912_vm8, %v1730_v13, %v355_v17  ;;  %v635_v39 = vadd.s32 %v1867_v35, %v1874_v59 }
 0x107   : > { %v650_v45 = vsel %vm1293_vm12, 0, %v1292_v51  ;;  %v564_v60 = vsel %vm1956_vm13, %v1728_v12, %v561_v32  ;;  %1410 = vcosq.f32 %v358_v43  ;;  %v428_v14 = vmul.u32 %v1890_v23, %v412_v31 }
 0x108   : > { %v651_v61 = vsub.s32 32, %v650_v45  ;;  %v655_v49 = vsub.s32 4294967266, %v650_v45  ;;  %1412 = vsinq.f32 %v358_v43  ;;  %v431_v62 = vadd.s32 1, %v1945_v46 }
 0x109   : > { %v359_v63 = vsel %vm1912_vm8, 0, %v357_v28  ;;  %v652_v1 = vshll.u32 %v643_v50, %v650_v45  ;;  %vm430_vm14 = vc.u32 %v1952_v56, %v1944_v54  ;;  %1414 = vsinq.f32 %v564_v60  ;;  %v2016_v43 = vpop.permute.xlu1 %1108 }
 0x10a   : > { %v653_v41 = vshrl.u32 %v635_v39, %v651_v61  ;;  %v656_v2 = vadd.s32 127, %v655_v49  ;;  %v432_v35 = vsel %vm430_vm14, %v431_v62, %v1945_v46  ;;  %v665_v23 = vsub.s32 4, %v1893_v47  ;;  %v1115_v39 = vpop.permute.xlu0 %1114 }
 0x10b   : > { %v433_v4 = vadd.s32 %v432_v35, %v428_v14  ;;  %1416 = vcosq.f32 %v564_v60  ;;  %v775_v53 = vadd.s32 3, %v359_v63  ;;  %vm581_vm15 = vcmp.lt.s32.totalorder %v1738_v21, 0 }
 0x10c   : > { %v654_v59 = vor.u32 %v653_v41, %v652_v1  ;;  %v657_v3 = vshll.u32 %v656_v2, 23  ;;  %v363_v50 = vand.u32 3, %v359_v63  ;;  %v562_v55 = vsub.s32 4, %v1825_v33 }
 0x10d   : > { %v434_v40 = vadd.s32 536870912, %v433_v4  ;;  %v666_v15 = vsel %vm581_vm15, %v665_v23, %v1893_v47  ;;  %vm1126_vm0 = vcmask 130048   ;;  %v776_v57 = vand.u32 3, %v775_v53 }
 0x10e   : > { %v658_v9 = vor.u32 4788187, %v657_v3  ;;  %v661_v11 = vcvt.s32.f32 %v654_v59  ;;  %vm1987_vm1 = vcmp.le.f32.partialorder %v579_v26, 0.7853982  ;;  %v563_v47 = vsel %vm478_vm7, %v562_v55, %v1825_v33 }
 0x10f   : > { %v1980_v42 = vshrl.u32 %v434_v40, 30  ;;  %vm362_vm2 = vweird.f32 %v1730_v13  ;;  %vm364_vm3 = vcmp.lt.s32.totalorder %v363_v50, 2  ;;  %v668_v26 = vsel %vm1987_vm1, 0, %v666_v15 }
 0x110   : > { %v659_v10 = vand.u32 2147483647, %v658_v9  ;;  %vm365_vm4 = vcmp.eq.s32.totalorder %v363_v50, 0  ;;  %vm1143_vm5 = vcmask 261120   ;;  %vm368_vm6 = vcmp.eq.s32.totalorder %v363_v50, 2 }
 0x111   : > { %v1411_v16 = vpop.eup %1410  ;;  %v436_v48 = vshll.u32 %v1980_v42, 30  ;;  %vm778_vm8 = vcmp.eq.s32.totalorder %v776_v57, 0  ;;  %vm781_vm9 = vcmp.eq.s32.totalorder %v776_v57, 2  ;;  %v565_v33 = vsel %vm1956_vm13, 0, %v563_v47 }
 0x112   : > { %v662_v18 = vmul.f32 %v661_v11, %v659_v10  ;;  %v1413_v20 = vpop.eup %1412  ;;  %v369_v22 = vxor.u32 2147483648, %v1411_v16  ;;  %v1087_v25 = vadd.s32 3, %v668_v26  ;;  %vm568_vm7 = vweird.f32 %v1728_v12  ;;  %v1119_v11 = vpop.permute.xlu0 %1118 }
 0x113   : > { %v2002_v24 = vsub.s32 %v433_v4, %v436_v48  ;;  %v366_v27 = vxor.u32 2147483648, %v1413_v20  ;;  %v2004_v28 = vpop.eup %1414  ;;  %vm777_vm10 = vcmp.lt.s32.totalorder %v776_v57, 2  ;;  %v569_v45 = vand.u32 3, %v565_v33 }
 0x114   : > { %v663_v37 = vxor.u32 2147483648, %v662_v18  ;;  %v370_v51 = vsel %vm368_vm6, %v369_v22, %v1413_v20  ;;  %v783_v30 = vsel %vm781_vm9, %v369_v22, %v1413_v20  ;;  %v2019_v61 = vand.u32 3, %v668_v26 }
 0x115   : > { %v439_v34 = vsub.s32 0, %v2002_v24  ;;  %v1417_v31 = vpop.eup %1416  ;;  %v367_v46 = vsel %vm365_vm4, %v1411_v16, %v366_v27  ;;  %v780_v17 = vsel %vm778_vm8, %v1411_v16, %v366_v27  ;;  %v572_v49 = vxor.u32 2147483648, %v2004_v28 }
 0x116   : > { %v664_v32 = vsel %vm581_vm15, %v663_v37, %v662_v18  ;;  %v371_v60 = vsel %vm364_vm3, %v367_v46, %v370_v51  ;;  %v784_v63 = vsel %vm777_vm10, %v780_v17, %v783_v30  ;;  %v575_v1 = vxor.u32 2147483648, %v1417_v31 }
 0x117   : > { %v667_v52 = vsel %vm1987_vm1, %v1738_v21, %v664_v32  ;;  %v1283_v58 = vmin.u32 %v439_v34, %v2002_v24  ;;  %v372_v62 = vsel %vm362_vm2, nan, %v371_v60  ;;  %v429_v41 = vadd.s32 %v1944_v54, %v1952_v56  ;;  %v2032_v54 = vpop.permute.xlu1 %1116 }
 0x118   : > { %1418 = vcosq.f32 %v667_v52  ;;  %v785_v2 = vsel %vm362_vm2, nan, %v784_v63  ;;  %v1127_v35 = vsel %vm1126_vm0, %v1975_v44, %v1115_v39  ;;  %v1088_v59 = vand.u32 3, %v1087_v25 }
 0x119   : > { %1420 = vsinq.f32 %v667_v52  ;;  %v441_v14 = vclz %v1283_v58  ;;  %v1131_v4 = vmul.f32 %v372_v62, %v1711_v6  ;;  %v1135_v23 = vmul.f32 %v1127_v35, %v785_v2 }
 0x11a   : > { %vm571_vm11 = vcmp.eq.s32.totalorder %v569_v45, 0  ;;  %vm674_vm12 = vcmp.eq.s32.totalorder %v2019_v61, 0  ;;  %vm574_vm13 = vcmp.eq.s32.totalorder %v569_v45, 2  ;;  %v983_v9 = vadd.s32 3, %v565_v33 }
 0x11b   : > { %v1284_v3 = vadd.s32 4294967294, %v441_v14  ;;  %v573_v53 = vsel %vm571_vm11, %v1417_v31, %v572_v49  ;;  %v1139_v13 = vadd.f32 %v1135_v23, %v1131_v4  ;;  %vm673_vm15 = vcmp.lt.s32.totalorder %v2019_v61, 2  ;;  %v1121_v32 = vpop.permute.xlu1 %1120 }
 0x11c   : > { %vm570_vm1 = vcmp.lt.s32.totalorder %v569_v45, 2  ;;  %v576_v56 = vsel %vm574_vm13, %v575_v1, %v2004_v28  ;;  %vm671_vm2 = vweird.f32 %v1738_v21  ;;  %vm677_vm3 = vcmp.eq.s32.totalorder %v2019_v61, 2 }
 0x11d   : > { %vm1285_vm14 = vcmp.lt.s32.totalorder %v1284_v3, 0  ;;  %v577_v6 = vsel %vm570_vm1, %v573_v53, %v576_v56  ;;  %v984_v40 = vand.u32 3, %v983_v9  ;;  %1144 = vst.msk [vmem:[%s2040_s7] sm:$0xff] %vm1143_vm5, %v1139_v13  ;;  %vm1093_vm4 = vcmp.eq.s32.totalorder %v1088_v59, 2 }
 0x11e   : > { %v444_v44 = vsel %vm1285_vm14, 0, %v1284_v3  ;;  %v578_v10 = vsel %vm568_vm7, nan, %v577_v6  ;;  %v1129_v37 = vsel %vm1126_vm0, %v1994_v19, %v1119_v11  ;;  %vm1090_vm10 = vcmp.eq.s32.totalorder %v1088_v59, 0 }
 0x11f   : > { %v445_v50 = vsub.s32 32, %v444_v44  ;;  %v449_v55 = vsub.s32 4294967266, %v444_v44  ;;  %v446_v15 = vshll.u32 %v2002_v24, %v444_v44  ;;  %vm985_vm6 = vcmp.lt.s32.totalorder %v984_v40, 2 }
 0x120   : > { %vm986_vm8 = vcmp.eq.s32.totalorder %v984_v40, 0  ;;  %vm989_vm9 = vcmp.eq.s32.totalorder %v984_v40, 2  ;;  %v1133_v26 = vmul.f32 %v578_v10, %v1717_v8  ;;  %vm1089_vm11 = vcmp.lt.s32.totalorder %v1088_v59, 2 }
 0x121   : > { %v447_v16 = vshrl.u32 %v429_v41, %v445_v50  ;;  %v450_v0 = vadd.s32 127, %v449_v55  ;;  %v988_v18 = vsel %vm986_vm8, %v1417_v31, %v572_v49  ;;  %v991_v48 = vsel %vm989_vm9, %v575_v1, %v2004_v28 }
 0x122   : > { %v1419_v57 = vpop.eup %1418  ;;  %v992_v22 = vsel %vm985_vm6, %v988_v18, %v991_v48  ;;  %v1130_v46 = vsel %vm1126_vm0, %v2016_v43, %v1121_v32  ;;  %v459_v14 = vsub.s32 4, %v1980_v42  ;;  %v1128_v40 = vsel %vm1126_vm0, %v1992_v36, %v2032_v54 }
 0x123   : > { %v1421_v47 = vpop.eup %1420  ;;  %v678_v20 = vxor.u32 2147483648, %v1419_v57  ;;  %v448_v27 = vor.u32 %v447_v16, %v446_v15  ;;  %v451_v33 = vshll.u32 %v450_v0, 23  ;;  %v993_v34 = vsel %vm568_vm7, nan, %v992_v22 }
 0x124   : > { %v675_v24 = vxor.u32 2147483648, %v1421_v47  ;;  %v1137_v25 = vmul.f32 %v1129_v37, %v993_v34  ;;  %vm375_vm7 = vcmp.lt.s32.totalorder %v1744_v29, 0 }
 0x125   : > { %v679_v51 = vsel %vm677_vm3, %v678_v20, %v1421_v47  ;;  %v1095_v28 = vsel %vm1093_vm4, %v678_v20, %v1421_v47  ;;  %v452_v31 = vor.u32 4788187, %v451_v33  ;;  %v455_v58 = vcvt.s32.f32 %v448_v27 }
 0x126   : > { %v676_v8 = vsel %vm674_vm12, %v1419_v57, %v675_v24  ;;  %v1092_v19 = vsel %vm1090_vm10, %v1419_v57, %v675_v24  ;;  %v1141_v17 = vadd.f32 %v1137_v25, %v1133_v26  ;;  %vm374_vm12 = vcmp.le.f32.partialorder %v373_v38, 0.7853982 }
 0x127   : > { %v680_v52 = vsel %vm673_vm15, %v676_v8, %v679_v51  ;;  %v1096_v12 = vsel %vm1089_vm11, %v1092_v19, %v1095_v28  ;;  %v453_v30 = vand.u32 2147483647, %v452_v31  ;;  %v460_v21 = vsel %vm375_vm7, %v459_v14, %v1980_v42 }
 0x128   : > { %v681_v39 = vsel %vm671_vm2, nan, %v680_v52  ;;  %v1097_v45 = vsel %vm671_vm2, nan, %v1096_v12  ;;  %1146 = vst.msk [vmem:[%s2040_s7 + $0x10] sm:$0xff] %vm1143_vm5, %v1141_v17  ;;  %v462_v1 = vsel %vm374_vm12, 0, %v460_v21  ;;  %vm465_vm4 = vweird.f32 %v1744_v29 }
 0x129   : > { %v1134_v60 = vmul.f32 %v681_v39, %v1715_v7  ;;  %v1138_v49 = vmul.f32 %v1130_v46, %v1097_v45  ;;  %v456_v61 = vmul.f32 %v455_v58, %v453_v30  ;;  %v879_v41 = vadd.s32 3, %v462_v1 }
 0x12a   : > { %v466_v2 = vand.u32 3, %v462_v1 }
 0x12b   : > { %v1142_v62 = vadd.f32 %v1138_v49, %v1134_v60  ;;  %v457_v63 = vxor.u32 2147483648, %v456_v61  ;;  %v880_v35 = vand.u32 3, %v879_v41 }
 0x12c   : > { %vm471_vm13 = vcmp.eq.s32.totalorder %v466_v2, 2  ;;  %vm468_vm15 = vcmp.eq.s32.totalorder %v466_v2, 0  ;;  %vm467_vm2 = vcmp.lt.s32.totalorder %v466_v2, 2 }
 0x12d   : > { %1147 = vst.msk [vmem:[%s2040_s7 + $0x18] sm:$0xff] %vm1143_vm5, %v1142_v62  ;;  %v458_v43 = vsel %vm375_vm7, %v457_v63, %v456_v61  ;;  %vm885_vm14 = vcmp.eq.s32.totalorder %v880_v35, 2  ;;  %vm882_vm1 = vcmp.eq.s32.totalorder %v880_v35, 0  ;;  %vm881_vm3 = vcmp.lt.s32.totalorder %v880_v35, 2 }
 0x12e   : > { %v461_v7 = vsel %vm374_vm12, %v1744_v29, %v458_v43 }
 0x12f   : > { %1422 = vcosq.f32 %v461_v7 }
 0x130   : > { %1424 = vsinq.f32 %v461_v7 }
 0x139   : > { %v1423_v59 = vpop.eup %1422 }
 0x13a   : > { %v1425_v3 = vpop.eup %1424  ;;  %v472_v4 = vxor.u32 2147483648, %v1423_v59 }
 0x13b   : > { %v469_v23 = vxor.u32 2147483648, %v1425_v3 }
 0x13c   : > { %v473_v38 = vsel %vm471_vm13, %v472_v4, %v1425_v3  ;;  %v887_v42 = vsel %vm885_vm14, %v472_v4, %v1425_v3 }
 0x13d   : > { %v470_v53 = vsel %vm468_vm15, %v1423_v59, %v469_v23  ;;  %v884_v9 = vsel %vm882_vm1, %v1423_v59, %v469_v23 }
 0x13e   : > { %v474_v13 = vsel %vm467_vm2, %v470_v53, %v473_v38  ;;  %v888_v56 = vsel %vm881_vm3, %v884_v9, %v887_v42 }
 0x13f   : > { %v475_v44 = vsel %vm465_vm4, nan, %v474_v13  ;;  %v889_v6 = vsel %vm465_vm4, nan, %v888_v56 }
 0x140   : > { %v1132_v50 = vmul.f32 %v475_v44, %v1709_v5  ;;  %v1136_v55 = vmul.f32 %v1128_v40, %v889_v6 }
 0x142   : > { %v1140_v29 = vadd.f32 %v1136_v55, %v1132_v50 }
 0x144   : > { %1145 = vst.msk [vmem:[%s2040_s7 + $0x8] sm:$0xff] %vm1143_vm5, %v1140_v29 }
 0x145   : > { %1469 = shalt.err (!%p1466_p5)
}
 0x146   : > { %s1470_s28 = scalar_lea.hbm %s2087_s8, 512  ;;  %s1474_s30 = scalar_lea.hbm %s2143_s3, 1024 }
 0x147   : > { %p1471_p4 = scmp.ne.s32.totalorder %s2087_s8, %s1470_s28  ;;  %p1475_p12 = scmp.lt.u32.totalorder %s2087_s8, %s2143_s3 }
 0x148   : > { %p1476_p1 = scmp.lt.u32.totalorder %s1474_s30, %s1470_s28  ;;  %p1478_p8 = scmp.lt.u32.totalorder %s1470_s28, %s2087_s8 }
 0x149   : > { %p1472_p7 = pnand %p1471_p4, %p2157_p9 }
 0x14a   : > { %p1477_p3 = por %p1476_p1, %p1475_p12 }
 0x14b   : > { %p1473_p10 = pneg %p1472_p7 }
 0x14c   : > { %p1479_p11 = por %p1478_p8, %p1477_p3 }
 0x14e   : > { %p1480_p0 = pnand %p1479_p11, %p1473_p10 }
 0x150   : > { %1483 = shalt.err (!%p1480_p0)
}
 0x151   : > { %s1553_s7 = smov 128   ;;  %s1554_s18 = smov 8  }
 0x152   : > { %1335 = dma.vmem_to_hbm [thread:$0]  (%p2157_p9), %s2089_s19, 512, %s2087_s8, %s1149_s15, %s1553_s7, %s1553_s7, %s1554_s18  }
 0x153 PF: > { %s1179_s21 = sand.u32 1, %s1518_s12   ;;  %p2158_p6 = scmp.ne.s32.totalorder %s2148_s27, 0 }
 0x154   : > { %p2159_p13 = scmp.ge.s32.totalorder %s1538_s17, 2  ;;  %s1180_s6 = scalar_lea.sflag [#allocation4], %s1179_s21 }
 0x156   : > { %p1342_p2 = pnand %p2159_p13, %p2158_p6 }
 0x158   : > { %1513 = dma.done.wait (!%p1342_p2), %s1180_s6, 512  }
 0x159   : > { %1515 = vsyncadd (!%p1342_p2), %s1180_s6, 4294966784  ;;  %s19_s17 = sadd.s32 1, %s1538_s17   ;;  %s2160_s12 = smov %s1522_s13 }
 0x15a   : > { %p16_p5 = scmp.ge.s32.totalorder %s19_s17, 4   ;;  %s2161_s13 = smov %s1526_s14 }
 0x15b   : > { %s2162_s14 = smov %s1631_s26  ;;  %s2163_s15 = smov %s1534_s16 }
 0x15c   : > { %s2164_s16 = smov %s2166_s20  ;;  %18 = sbr.rel (!%p16_p5) target bundleno = 6 (0x6), region = 80 }
 0x163   :  { %1185 = vsyncpa [#allocation3], 1 }
 0x164   :  { %1187 = vsyncpa [#allocation3 + $0x1], 1 }
 0x165   :  { %1188 = vsyncpa [#allocation4], 1 }
 0x166   :  { %1190 = vsyncpa [#allocation4 + $0x1], 1 }

</bundles_post_ra>
